<compile_context>
chip_gen: v6e
topology: v6e:2x2x1
jax: 0.10.0
libtpu: 0.0.40
codegen_flags: <defaults>
</compile_context>

<pallas_src>
import jax
import jax.numpy as jnp
from jax.experimental import pallas as pl
from jax.experimental.pallas import tpu as pltpu


def _round_up(n, m):
    return ((n + m - 1) // m) * m


def policy_net_kernel(x_ref, w1_ref, b1_ref, w2t_ref, b2_ref, out_ref):
    # x:   (4, TB)   batch on lanes
    # w1:  (16, 4)   (out_features, in_features)  -- PyTorch layout
    # b1:  (16, 1)
    # w2t: (16, 2)   (in_features, out_features)
    # b2:  (2, 1)
    # out: (2, TB)
    x = x_ref[...]
    w1 = w1_ref[...]

    # ---- Layer 1: h[j, :] = sum_k w1[j, k] * x[k, :] + b1[j]  (pure VPU FMAs) ----
    h = b1_ref[...] + w1[:, 0:1] * x[0:1, :]          # (16,1)*(1,TB) -> (16, TB)
    for k in range(1, 4):                             # static unroll, K = 4
        h = h + w1[:, k:k + 1] * x[k:k + 1, :]
    h = jnp.maximum(h, 0.0)                           # ReLU, (16, TB)

    # ---- Layer 2 + 2-class softmax as sigmoid of the logit difference ----
    w2t = w2t_ref[...]                                # (16, 2)
    wd = w2t[:, 0:1] - w2t[:, 1:2]                    # (16, 1)  = w2[0,:] - w2[1,:]
    bd = b2_ref[0:1, :] - b2_ref[1:2, :]              # (1, 1)
    d = jnp.sum(wd * h, axis=0, keepdims=True) + bd   # (1, TB)  = logit0 - logit1
    p0 = jax.nn.sigmoid(d)                            # == softmax prob of class 0

    out_ref[0:1, :] = p0.astype(out_ref.dtype)
    out_ref[1:2, :] = (1.0 - p0).astype(out_ref.dtype)


def policy_net_forward(x, w1, b1, w2, b2, *, block_b=8192):
    """Forward pass of PolicyNet.

    Args (PyTorch layouts):
      x:  (B, 4) float32
      w1: (16, 4), b1: (16,)   -- nn.Linear(4, 16)
      w2: (2, 16), b2: (2,)    -- nn.Linear(16, 2)
    Returns:
      (B, 2) float32 softmax probabilities (Softmax(dim=1)).
    """
    B = x.shape[0]
    TB = min(block_b, _round_up(max(B, 1), 128))      # lane-dense batch tile
    Bp = _round_up(B, TB)                             # pad batch to tile multiple

    # Batch-on-lanes layout + padding (padded columns are harmless; sliced off).
    xt = jnp.pad(x.T.astype(jnp.float32), ((0, 0), (0, Bp - B)))   # (4, Bp)
    w1k = w1.astype(jnp.float32)                                    # (16, 4)
    b1k = b1.astype(jnp.float32).reshape(16, 1)                     # (16, 1)
    w2k = w2.T.astype(jnp.float32)                                  # (16, 2)
    b2k = b2.astype(jnp.float32).reshape(2, 1)                      # (2, 1)

    out_t = pl.pallas_call(
        policy_net_kernel,
        out_shape=jax.ShapeDtypeStruct((2, Bp), jnp.float32),
        grid_spec=pltpu.PrefetchScalarGridSpec(
            num_scalar_prefetch=0,
            grid=(Bp // TB,),
            in_specs=[
                pl.BlockSpec((4, TB), lambda i: (0, i)),    # x: streamed per tile
                pl.BlockSpec((16, 4), lambda i: (0, 0)),    # weights: VMEM-resident
                pl.BlockSpec((16, 1), lambda i: (0, 0)),
                pl.BlockSpec((16, 2), lambda i: (0, 0)),
                pl.BlockSpec((2, 1), lambda i: (0, 0)),
            ],
            out_specs=pl.BlockSpec((2, TB), lambda i: (0, i)),
        ),
        compiler_params=pltpu.CompilerParams(
            dimension_semantics=("parallel",),   # v7x: shard batch tiles over both TCs
        ),
    )(xt, w1k, b1k, w2k, b2k)

    return out_t[:, :B].T                               # back to (B, 2)


def init_params(key):
    # PyTorch nn.Linear default init: U[-1/sqrt(fan_in), 1/sqrt(fan_in)], PyTorch layouts.
    k1, k2, k3, k4 = jax.random.split(key, 4)
    bound1 = 1.0 / jnp.sqrt(4.0)
    bound2 = 1.0 / jnp.sqrt(16.0)
    w1 = jax.random.uniform(k1, (16, 4), jnp.float32, -bound1, bound1)
    b1 = jax.random.uniform(k2, (16,), jnp.float32, -bound1, bound1)
    w2 = jax.random.uniform(k3, (2, 16), jnp.float32, -bound2, bound2)
    b2 = jax.random.uniform(k4, (2,), jnp.float32, -bound2, bound2)
    return w1, b1, w2, b2


# TODO(synk): PolicyNet.act() (Categorical sampling + log_prob) is host/RL-loop logic,
#             not part of the module's forward pass, and is not implemented here.

if __name__ == "__main__":
    key = jax.random.PRNGKey(0)
    k_x, k_p = jax.random.split(key)

    B = 200  # small batch (not a multiple of 128, exercises the padding path)
    x = jax.random.normal(k_x, (B, 4), jnp.float32)
    w1, b1, w2, b2 = init_params(k_p)

    out = jax.block_until_ready(policy_net_forward(x, w1, b1, w2, b2))

    # Sanity check against plain-JAX reference (PyTorch semantics: y = x @ W.T + b).
    h_ref = jnp.maximum(x @ w1.T + b1, 0.0)
    ref = jax.nn.softmax(h_ref @ w2.T + b2, axis=1)
    assert out.shape == (B, 2)
    assert jnp.allclose(out, ref, atol=1e-5, rtol=1e-5)
    assert jnp.allclose(jnp.sum(out, axis=1), 1.0, atol=1e-5)

    print("KERNEL_OK")
</pallas_src>

<mosaic_0001>
module attributes {stable_mosaic.version = 11 : i64} {
  func.func @policy_net_kernel(%arg0: i32, %arg1: memref<4x256xf32, #tpu.memory_space<vmem>>, %arg2: memref<16x4xf32, #tpu.memory_space<vmem>>, %arg3: memref<16x1xf32, #tpu.memory_space<vmem>>, %arg4: memref<16x2xf32, #tpu.memory_space<vmem>>, %arg5: memref<2x1xf32, #tpu.memory_space<vmem>>, %arg6: memref<2x256xf32, #tpu.memory_space<vmem>>) attributes {dimension_semantics = [#tpu.dimension_semantics<parallel>], iteration_bounds = array<i64: 1>, scalar_prefetch = 0 : i64, scratch_operands = 0 : i64, tpu.core_type = #tpu.core_type<tc>, window_params = [{transform_indices = @transform_0, window_bounds = array<i64: 4, 256>}, {pipeline_mode = #tpu.pipeline_mode<synchronous>, transform_indices = @transform_1, window_bounds = array<i64: 16, 4>}, {pipeline_mode = #tpu.pipeline_mode<synchronous>, transform_indices = @transform_2, window_bounds = array<i64: 16, 1>}, {pipeline_mode = #tpu.pipeline_mode<synchronous>, transform_indices = @transform_3, window_bounds = array<i64: 16, 2>}, {pipeline_mode = #tpu.pipeline_mode<synchronous>, transform_indices = @transform_4, window_bounds = array<i64: 2, 1>}, {transform_indices = @transform_5, window_bounds = array<i64: 2, 256>}]} {
    %c0 = arith.constant 0 : index
    %c0_0 = arith.constant 0 : index
    %0 = vector.load %arg1[%c0, %c0_0] : memref<4x256xf32, #tpu.memory_space<vmem>>, vector<4x256xf32>
    %c0_1 = arith.constant 0 : index
    %c0_2 = arith.constant 0 : index
    %1 = vector.load %arg2[%c0_1, %c0_2] : memref<16x4xf32, #tpu.memory_space<vmem>>, vector<16x4xf32>
    %c0_3 = arith.constant 0 : index
    %c0_4 = arith.constant 0 : index
    %2 = vector.load %arg3[%c0_3, %c0_4] : memref<16x1xf32, #tpu.memory_space<vmem>>, vector<16x1xf32>
    %3 = vector.extract_strided_slice %1 {offsets = [0, 0], sizes = [16, 1], strides = [1, 1]} : vector<16x4xf32> to vector<16x1xf32>
    %4 = vector.extract_strided_slice %0 {offsets = [0, 0], sizes = [1, 256], strides = [1, 1]} : vector<4x256xf32> to vector<1x256xf32>
    %5 = vector.broadcast %3 : vector<16x1xf32> to vector<16x256xf32>
    %6 = vector.broadcast %4 : vector<1x256xf32> to vector<16x256xf32>
    %7 = arith.mulf %5, %6 : vector<16x256xf32>
    %8 = vector.broadcast %2 : vector<16x1xf32> to vector<16x256xf32>
    %9 = arith.addf %8, %7 : vector<16x256xf32>
    %10 = vector.extract_strided_slice %1 {offsets = [0, 1], sizes = [16, 1], strides = [1, 1]} : vector<16x4xf32> to vector<16x1xf32>
    %11 = vector.extract_strided_slice %0 {offsets = [1, 0], sizes = [1, 256], strides = [1, 1]} : vector<4x256xf32> to vector<1x256xf32>
    %12 = vector.broadcast %10 : vector<16x1xf32> to vector<16x256xf32>
    %13 = vector.broadcast %11 : vector<1x256xf32> to vector<16x256xf32>
    %14 = arith.mulf %12, %13 : vector<16x256xf32>
    %15 = arith.addf %9, %14 : vector<16x256xf32>
    %16 = vector.extract_strided_slice %1 {offsets = [0, 2], sizes = [16, 1], strides = [1, 1]} : vector<16x4xf32> to vector<16x1xf32>
    %17 = vector.extract_strided_slice %0 {offsets = [2, 0], sizes = [1, 256], strides = [1, 1]} : vector<4x256xf32> to vector<1x256xf32>
    %18 = vector.broadcast %16 : vector<16x1xf32> to vector<16x256xf32>
    %19 = vector.broadcast %17 : vector<1x256xf32> to vector<16x256xf32>
    %20 = arith.mulf %18, %19 : vector<16x256xf32>
    %21 = arith.addf %15, %20 : vector<16x256xf32>
    %22 = vector.extract_strided_slice %1 {offsets = [0, 3], sizes = [16, 1], strides = [1, 1]} : vector<16x4xf32> to vector<16x1xf32>
    %23 = vector.extract_strided_slice %0 {offsets = [3, 0], sizes = [1, 256], strides = [1, 1]} : vector<4x256xf32> to vector<1x256xf32>
    %24 = vector.broadcast %22 : vector<16x1xf32> to vector<16x256xf32>
    %25 = vector.broadcast %23 : vector<1x256xf32> to vector<16x256xf32>
    %26 = arith.mulf %24, %25 : vector<16x256xf32>
    %27 = arith.addf %21, %26 : vector<16x256xf32>
    %cst = arith.constant 0.000000e+00 : f32
    %28 = vector.broadcast %cst : f32 to vector<16x256xf32>
    %29 = arith.maximumf %27, %28 : vector<16x256xf32>
    %c0_5 = arith.constant 0 : index
    %c0_6 = arith.constant 0 : index
    %30 = vector.load %arg4[%c0_5, %c0_6] : memref<16x2xf32, #tpu.memory_space<vmem>>, vector<16x2xf32>
    %31 = vector.extract_strided_slice %30 {offsets = [0, 0], sizes = [16, 1], strides = [1, 1]} : vector<16x2xf32> to vector<16x1xf32>
    %32 = vector.extract_strided_slice %30 {offsets = [0, 1], sizes = [16, 1], strides = [1, 1]} : vector<16x2xf32> to vector<16x1xf32>
    %33 = arith.subf %31, %32 : vector<16x1xf32>
    %c0_7 = arith.constant 0 : index
    %c0_8 = arith.constant 0 : index
    %34 = vector.load %arg5[%c0_7, %c0_8] : memref<2x1xf32, #tpu.memory_space<vmem>>, vector<1x1xf32>
    %c1 = arith.constant 1 : index
    %c0_9 = arith.constant 0 : index
    %35 = vector.load %arg5[%c1, %c0_9] : memref<2x1xf32, #tpu.memory_space<vmem>>, vector<1x1xf32>
    %36 = arith.subf %34, %35 : vector<1x1xf32>
    %37 = vector.broadcast %33 : vector<16x1xf32> to vector<16x256xf32>
    %38 = arith.mulf %37, %29 : vector<16x256xf32>
    %cst_10 = arith.constant dense<0.000000e+00> : vector<256xf32>
    %39 = vector.multi_reduction <add>, %38, %cst_10 [0] : vector<16x256xf32> to vector<256xf32>
    %40 = vector.shape_cast %39 : vector<256xf32> to vector<1x256xf32>
    %41 = vector.broadcast %36 : vector<1x1xf32> to vector<1x256xf32>
    %42 = arith.addf %40, %41 : vector<1x256xf32>
    %43 = arith.negf %42 : vector<1x256xf32>
    %44 = math.exp %43 : vector<1x256xf32>
    %cst_11 = arith.constant 1.000000e+00 : f32
    %45 = vector.broadcast %cst_11 : f32 to vector<1x256xf32>
    %46 = arith.addf %45, %44 : vector<1x256xf32>
    %47 = arith.divf %45, %46 : vector<1x256xf32>
    %c0_12 = arith.constant 0 : index
    %c0_13 = arith.constant 0 : index
    %48 = vector.load %arg6[%c0_12, %c0_13] : memref<2x256xf32, #tpu.memory_space<vmem>>, vector<1x256xf32>
    tpu.vector_store %arg6[%c0_12, %c0_13], %47 {strides = array<i32>} : memref<2x256xf32, #tpu.memory_space<vmem>>, vector<1x256xf32>,
    %cst_14 = arith.constant 1.000000e+00 : f32
    %49 = vector.broadcast %cst_14 : f32 to vector<1x256xf32>
    %50 = arith.subf %49, %47 : vector<1x256xf32>
    %c1_15 = arith.constant 1 : index
    %c0_16 = arith.constant 0 : index
    %51 = vector.load %arg6[%c1_15, %c0_16] : memref<2x256xf32, #tpu.memory_space<vmem>>, vector<1x256xf32>
    tpu.vector_store %arg6[%c1_15, %c0_16], %50 {strides = array<i32>} : memref<2x256xf32, #tpu.memory_space<vmem>>, vector<1x256xf32>,
    return
  }
  func.func @transform_0(%arg0: i32) -> (i32, i32) {
    %c0_i32 = arith.constant 0 : i32
    %c0_i32_0 = arith.constant 0 : i32
    return %c0_i32, %arg0 : i32, i32
  }
  func.func @transform_1(%arg0: i32) -> (i32, i32) {
    %c0_i32 = arith.constant 0 : i32
    %c0_i32_0 = arith.constant 0 : i32
    %c0_i32_1 = arith.constant 0 : i32
    return %c0_i32, %c0_i32_0 : i32, i32
  }
  func.func @transform_2(%arg0: i32) -> (i32, i32) {
    %c0_i32 = arith.constant 0 : i32
    %c0_i32_0 = arith.constant 0 : i32
    %c0_i32_1 = arith.constant 0 : i32
    return %c0_i32, %c0_i32_0 : i32, i32
  }
  func.func @transform_3(%arg0: i32) -> (i32, i32) {
    %c0_i32 = arith.constant 0 : i32
    %c0_i32_0 = arith.constant 0 : i32
    %c0_i32_1 = arith.constant 0 : i32
    return %c0_i32, %c0_i32_0 : i32, i32
  }
  func.func @transform_4(%arg0: i32) -> (i32, i32) {
    %c0_i32 = arith.constant 0 : i32
    %c0_i32_0 = arith.constant 0 : i32
    %c0_i32_1 = arith.constant 0 : i32
    return %c0_i32, %c0_i32_0 : i32, i32
  }
  func.func @transform_5(%arg0: i32) -> (i32, i32) {
    %c0_i32 = arith.constant 0 : i32
    %c0_i32_0 = arith.constant 0 : i32
    return %c0_i32, %arg0 : i32, i32
  }
}

</mosaic_0001>

<bundles_post_ra>
// kernel: tpu_custom_call.1
= control target key start
LH: loop header
LB: loop body
LE: loop exit
PB: predicated region body
PF: predicated region fallthrough
CT: control target
= control target key end

     0   :  { %s348_s22 = smov 127   ;;  %v349_v2 = vmov 0   ;;  %s428_s0 = inlined_call_operand.vmem [shape: f32[4,256], index: 0, kind: input, shape index: {}]   ;;  %s429_s1 = inlined_call_operand.vmem [shape: f32[16,4], index: 1, kind: input, shape index: {}]   ;;  %s430_s2 = inlined_call_operand.vmem [shape: f32[16,1], index: 2, kind: input, shape index: {}]   ;;  %s431_s3 = inlined_call_operand.vmem [shape: f32[16,2], index: 3, kind: input, shape index: {}]   ;;  %s432_s4 = inlined_call_operand.vmem [shape: f32[2,1], index: 4, kind: input, shape index: {}]   ;;  %s433_s5 = inlined_call_operand.hbm [shape: f32[2,256], index: 5, kind: output, shape index: {}]  }
   0x1   :  { %v179_v0 = vld [vmem:[%s431_s3] sm:$0xff]  ;;  %309 = vset.pattern.permute.xlu1 %v349_v2  ;;  %v180_v3 = vld [vmem:[%s431_s3 + $0x8] sm:$0xff]  ;;  %310 = vset.pattern.permute.xlu0 %v349_v2 }
   0x2   :  { %v22_v1 = vld [vmem:[%s429_s1] sm:$0xff]  ;;  %183 = vrot.lane.b32.xlu0 %v179_v0, %s348_s22  ;;  %v23_v4 = vld [vmem:[%s429_s1 + $0x8] sm:$0xff] }
   0x3   :  { %28 = vperm.xlu1 %309, %v22_v1  }
   0x4   :  { %10 = vsyncpa [#allocation3], 0  ;;  %v24_v5 = vld [vmem:[%s430_s2] sm:$0xff]  ;;  %v25_v6 = vld [vmem:[%s430_s2 + $0x8] sm:$0xff]  ;;  %v350_v7 = vmov 1   ;;  %v351_v8 = vmov 3   ;;  %v37_v19 = vlaneseq }
   0x5   :  { %v352_v9 = vmov 2   ;;  %v191_v11 = vld [vmem:[%s432_s4] sm:$0x1]  ;;  %v192_v12 = vld [vmem:[%s432_s4 + $0x1] sm:$0x1] }
   0x6   :  { %185 = vrot.lane.b32.xlu0 %v180_v3, %s348_s22  ;;  %v193_v14 = vsub.f32 %v191_v11, %v192_v12  ;;  %v410_v20 = vshrl.u32 %v37_v19, 7  ;;  %v21_v24 = vld [vmem:[%s428_s0] sm:$0xff]  ;;  %vm261_vm0 = vcmp.lt.s32.totalorder %v37_v19, 256  ;;  %s354_s0 = smov [#allocation2]  }
   0x7   :  { %33 = vperm.xlu1 %309, %v23_v4   ;;  %s292_s8 = sshll.u32 %s354_s0, 4  ;;  %s293_s8 = int_to_ptr.vmem [resolvable:$true] %s292_s8 }
   0x8   :  { %v39_v22 = vsub.s32 0, %v410_v20  ;;  %v43_v23 = vsub.s32 4, %v410_v20  ;;  %v83_v28 = vsub.s32 1, %v410_v20  ;;  %v87_v29 = vsub.s32 5, %v410_v20  ;;  %s326_s9 = scalar_lea.vmem %s293_s8, 64  ;;  %p331_p1 = scmp.lt.s32.totalorder %s293_s8, %s293_s8 }
   0x9   :  { %v117_v30 = vsub.s32 2, %v410_v20  ;;  %v121_v31 = vsub.s32 6, %v410_v20  ;;  %v151_v40 = vsub.s32 3, %v410_v20  ;;  %v155_v41 = vsub.s32 7, %v410_v20  ;;  %p327_p0 = scmp.ne.s32.totalorder %s293_s8, %s326_s9  ;;  %p332_p2 = scmp.lt.s32.totalorder %s326_s9, %s326_s9 }
   0xa   :  { %61 = vperm.xlu0 %310, %v24_v5   ;;  %v40_v26 = vrot.slane %v21_v24, %v39_v22  ;;  %v44_v27 = vrot.slane %v21_v24, %v43_v23  ;;  %v84_v35 = vrot.slane %v21_v24, %v83_v28  ;;  %v88_v36 = vrot.slane %v21_v24, %v87_v29 }
   0xb   :  { %66 = vperm.xlu1 %309, %v25_v6   ;;  %v118_v38 = vrot.slane %v21_v24, %v117_v30  ;;  %v122_v39 = vrot.slane %v21_v24, %v121_v31  ;;  %v152_v51 = vrot.slane %v21_v24, %v151_v40  ;;  %v156_v52 = vrot.slane %v21_v24, %v155_v41  ;;  %p333_p3 = por %p332_p2, %p331_p1 }
   0xc   :  { %v50_v33 = vrot.slane %v40_v26, %v39_v22  ;;  %v54_v34 = vrot.slane %v44_v27, %v39_v22  ;;  %v94_v46 = vrot.slane %v84_v35, %v83_v28  ;;  %v98_v47 = vrot.slane %v88_v36, %v83_v28 }
   0xd   :  { %v128_v49 = vrot.slane %v118_v38, %v117_v30  ;;  %v132_v50 = vrot.slane %v122_v39, %v117_v30  ;;  %v162_v62 = vrot.slane %v152_v51, %v151_v40  ;;  %v166_v63 = vrot.slane %v156_v52, %v151_v40  ;;  %p334_p4 = pnand %p333_p3, %p327_p0 }
   0xe   :  { %312 = vset.pattern.permute.xlu0 %v350_v7 }
   0xf   :  { %311 = vset.pattern.permute.xlu1 %v350_v7  ;;  %78 = vperm.xlu0 %312, %v23_v4  }
  0x10   :  { %74 = vperm.xlu1 %311, %v22_v1  }
  0x13   :  { %314 = vset.pattern.permute.xlu0 %v351_v8 }
  0x14   :  { %313 = vset.pattern.permute.xlu1 %v352_v9  ;;  %142 = vperm.xlu0 %314, %v22_v1  }
  0x15   :  { %108 = vperm.xlu1 %313, %v22_v1  }
  0x18   :  { %317 = vset.pattern.permute.xlu0 %v349_v2 }
  0x19   :  { %112 = vperm.xlu1 %313, %v23_v4  }
  0x1d   :  { %315 = vset.pattern.permute.xlu1 %v351_v8 }
  0x1e   :  { %146 = vperm.xlu1 %315, %v23_v4  }
  0x22   :  { %316 = vset.pattern.permute.xlu1 %v349_v2 }
  0x74   :  { %v184_v10 = vpop.permute.xlu0 %183 }
  0x75   :  { %v189_v13 = vsub.f32 %v179_v0, %v184_v10 }
  0x77   :  { %196 = vperm.xlu1 %316, %v189_v13  }
  0x78   :  { %v186_v15 = vpop.permute.xlu0 %185 }
  0x79   :  { %v190_v16 = vsub.f32 %v180_v3, %v186_v15 }
  0x7b   :  { %201 = vperm.xlu0 %317, %v190_v16   ;;  %224 = vperm.xlu1 %316, %v193_v14  }
  0x7e   :  { %v29_v17 = vpop.permute.xlu1 %28 }
  0x7f   :  { %v55_v42 = vmul.f32 %v50_v33, %v29_v17  ;;  %v56_v43 = vmul.f32 %v54_v34, %v29_v17 }
  0x82   :  { %v34_v18 = vpop.permute.xlu1 %33 }
  0x83   :  { %v57_v44 = vmul.f32 %v50_v33, %v34_v18  ;;  %v58_v45 = vmul.f32 %v54_v34, %v34_v18 }
  0x85   :  { %v62_v32 = vpop.permute.xlu0 %61 }
  0x86   :  { %v67_v21 = vpop.permute.xlu1 %66  ;;  %v69_v55 = vadd.f32 %v62_v32, %v55_v42  ;;  %v70_v56 = vadd.f32 %v62_v32, %v56_v43 }
  0x87   :  { %v71_v58 = vadd.f32 %v67_v21, %v57_v44  ;;  %v72_v59 = vadd.f32 %v67_v21, %v58_v45 }
  0x8a   :  { %v79_v48 = vpop.permute.xlu0 %78 }
  0x8b   :  { %v75_v25 = vpop.permute.xlu1 %74  ;;  %v101_v60 = vmul.f32 %v94_v46, %v79_v48  ;;  %v102_v61 = vmul.f32 %v98_v47, %v79_v48 }
  0x8c   :  { %v99_v53 = vmul.f32 %v94_v46, %v75_v25  ;;  %v100_v54 = vmul.f32 %v98_v47, %v75_v25 }
  0x8d   :  { %v105_v4 = vadd.f32 %v101_v60, %v71_v58  ;;  %v106_v5 = vadd.f32 %v102_v61, %v72_v59 }
  0x8e   :  { %v103_v0 = vadd.f32 %v99_v53, %v69_v55  ;;  %v104_v1 = vadd.f32 %v100_v54, %v70_v56 }
  0x8f   :  { %v143_v8 = vpop.permute.xlu0 %142 }
  0x90   :  { %v109_v37 = vpop.permute.xlu1 %108  ;;  %v167_v12 = vmul.f32 %v162_v62, %v143_v8  ;;  %v168_v13 = vmul.f32 %v166_v63, %v143_v8 }
  0x91   :  { %v133_v2 = vmul.f32 %v128_v49, %v109_v37  ;;  %v134_v3 = vmul.f32 %v132_v50, %v109_v37 }
  0x93   :  { %v137_v10 = vadd.f32 %v133_v2, %v103_v0  ;;  %v138_v11 = vadd.f32 %v134_v3, %v104_v1 }
  0x94   :  { %v113_v57 = vpop.permute.xlu1 %112 }
  0x95   :  { %v135_v6 = vmul.f32 %v128_v49, %v113_v57  ;;  %v136_v7 = vmul.f32 %v132_v50, %v113_v57  ;;  %v171_v18 = vadd.f32 %v167_v12, %v137_v10  ;;  %v172_v21 = vadd.f32 %v168_v13, %v138_v11 }
  0x96   :  { %v353_v57 = vmov 1966171168  }
  0x97   :  { %v139_v14 = vadd.f32 %v135_v6, %v105_v4  ;;  %v140_v15 = vadd.f32 %v136_v7, %v106_v5  ;;  %v175_v25 = vmax.f32 %v171_v18, 0.0  ;;  %v176_v26 = vmax.f32 %v172_v21, 0.0 }
  0x98   :  { %v245_v58 = vunpack.c.l.s4 %v353_v57 }
  0x99   :  { %v147_v9 = vpop.permute.xlu1 %146 }
  0x9a   :  { %v169_v16 = vmul.f32 %v162_v62, %v147_v9  ;;  %v170_v17 = vmul.f32 %v166_v63, %v147_v9  ;;  %v246_v59 = vunpack.c.0.s8 %v245_v58 }
  0x9c   :  { %v173_v22 = vadd.f32 %v169_v16, %v139_v14  ;;  %v174_v23 = vadd.f32 %v170_v17, %v140_v15  ;;  %v249_v61 = vsub.s32 %v246_v59, %v410_v20 }
  0x9e   :  { %v177_v27 = vmax.f32 %v173_v22, 0.0  ;;  %v178_v28 = vmax.f32 %v174_v23, 0.0 }
  0xf2   :  { %v197_v24 = vpop.permute.xlu1 %196 }
  0xf3   :  { %v204_v30 = vmul.f32 %v197_v24, %v175_v25  ;;  %v205_v31 = vmul.f32 %v197_v24, %v176_v26 }
  0xf6   :  { %v202_v29 = vpop.permute.xlu0 %201  ;;  %v225_v48 = vpop.permute.xlu1 %224 }
  0xf7   :  { %v206_v32 = vmul.f32 %v202_v29, %v177_v27  ;;  %v207_v33 = vmul.f32 %v202_v29, %v178_v28 }
  0xf9   :  { %v208_v34 = vadd.f32 %v206_v32, %v204_v30  ;;  %v215_v35 = vadd.f32 %v207_v33, %v205_v31 }
  0xfb   :  { %v209_v36 = vrot.slane %v208_v34, 4  ;;  %v216_v37 = vrot.slane %v215_v35, 4 }
  0xfd   :  { %v210_v38 = vadd.f32 %v209_v36, %v208_v34  ;;  %v217_v39 = vadd.f32 %v216_v37, %v215_v35 }
  0xff   :  { %v211_v40 = vrot.slane %v210_v38, 2  ;;  %v218_v41 = vrot.slane %v217_v39, 2 }
 0x101   :  { %v212_v42 = vadd.f32 %v211_v40, %v210_v38  ;;  %v219_v43 = vadd.f32 %v218_v41, %v217_v39 }
 0x103   :  { %v213_v44 = vrot.slane %v212_v42, 1  ;;  %v220_v45 = vrot.slane %v219_v43, 1 }
 0x105   :  { %v214_v46 = vadd.f32 %v213_v44, %v212_v42  ;;  %v221_v47 = vadd.f32 %v220_v45, %v219_v43 }
 0x107   :  { %v227_v49 = vadd.f32 %v225_v48, %v214_v46  ;;  %v228_v50 = vadd.f32 %v225_v48, %v221_v47 }
 0x109   :  { %v300_v51 = vmul.f32 -1.442695, %v227_v49  ;;  %v301_v52 = vmul.f32 -1.442695, %v228_v50 }
 0x10b   :  { %318 = vpow2.f32 %v300_v51 }
 0x10c   :  { %320 = vpow2.f32 %v301_v52 }
 0x118   :  { %v319_v53 = vpop.eup %318 }
 0x119   :  { %v321_v54 = vpop.eup %320  ;;  %v235_v55 = vadd.f32 1.0, %v319_v53 }
 0x11a   :  { %v236_v56 = vadd.f32 1.0, %v321_v54 }
 0x11b   :  { %322 = vrcp.f32 %v235_v55 }
 0x11c   :  { %324 = vrcp.f32 %v236_v56 }
 0x128   :  { %v323_v60 = vpop.eup %322 }
 0x129   :  { %v325_v62 = vpop.eup %324  ;;  %v264_v63 = vsub.f32 1.0, %v323_v60 }
 0x12a   :  { %v243_v0 = vcombine.low %v323_v60, %v325_v62  ;;  %v265_v1 = vsub.f32 1.0, %v325_v62 }
 0x12c   :  { %v250_v2 = vrot.slane %v243_v0, %v249_v61  ;;  %v268_v3 = vcombine.low %v264_v63, %v265_v1 }
 0x12e   :  { %v257_v4 = vrot.slane %v250_v2, %v249_v61  ;;  %v275_v5 = vrot.slane %v268_v3, %v249_v61 }
 0x130   :  { %263 = vst.msk [vmem:[#allocation2] ss:$2 sm:$0x3] %vm261_vm0, %v257_v4  ;;  %v282_v6 = vrot.slane %v275_v5, %v249_v61 }
 0x132   :  { %285 = vst.msk [vmem:[#allocation2 + $0x1] ss:$2 sm:$0x3] %vm261_vm0, %v282_v6 }
 0x133   :  { %337 = shalt.err (!%p334_p4)
}
 0x134   :  { %295 = dma.vmem_to_hbm [thread:$0]  %s293_s8, 64, %s433_s5, [#allocation3]  }
 0x135   :  { %346 = dma.done.wait [#allocation3], 64  }
 0x136   :  { %347 = vsyncadd [#allocation3], 4294967232 }
 0x137   :  { %299 = vsyncpa [#allocation3], 1 }

</bundles_post_ra>
